<compile_context>
chip_gen: v7x
topology: tpu7x:2x2x1
jax: 0.10.0
libtpu: 0.0.40
codegen_flags: <defaults>
</compile_context>

<pallas_src>
import jax
import jax.numpy as jnp
from jax.experimental import pallas as pl
from jax.experimental.pallas import tpu as pltpu


def temporal_embedding_kernel(x_ref, a_ref, c_ref, wper_ref, wlin_ref,
                              bias_ref, o_ref):
    # x_ref:    (TB, D)      raw inputs for this batch tile
    # a_ref:    (D, D*K)     A[d', d*K+k] = (d'==d) * w[d, k]   (block-diag of w rows)
    # c_ref:    (1, D*K)     b flattened row-major
    # wper_ref: (D*K, D*P)   kron(I_D, W_proj[1:])              (periodic -> projection)
    # wlin_ref: (D, D*P)     kron(diag(w0), W_proj[0:1])        (linear term, w0 folded in)
    # bias_ref: (1, D*P)     b0[d] * W_proj[0, :] + b_proj      (flattened over d)
    # o_ref:    (TB, D*P)
    x = x_ref[...].astype(jnp.float32)                                    # (TB, D)
    # sin argument, lane-dense (TB, D*K): the per-k replication of x and the
    # multiply by w are a tiny block-diagonal matmul (MXU has huge slack).
    arg = jnp.dot(x, a_ref[...], preferred_element_type=jnp.float32) + c_ref[...]
    per = jnp.sin(arg)                                                    # EUP-bound
    out = jnp.dot(per, wper_ref[...], preferred_element_type=jnp.float32)  # (TB, D*P)
    out = out + jnp.dot(x, wlin_ref[...], preferred_element_type=jnp.float32)
    out = out + bias_ref[...]
    o_ref[...] = out.astype(o_ref.dtype)


def temporal_embedding(x, w0, b0, w, b, w_proj, b_proj, *, batch_tile=2048):
    """x: (B, D) -> (B, D, proj_dim).  w_proj is stored as (embed_dim, proj_dim)."""
    B, D = x.shape
    E, P = w_proj.shape          # (embed_dim, proj_dim)
    K = E - 1

    f32 = jnp.float32
    w0f, b0f = w0.astype(f32), b0.astype(f32)
    wf, bf = w.astype(f32), b.astype(f32)
    wpf, bpf = w_proj.astype(f32), b_proj.astype(f32)

    # --- parameter-only precompute (cheap, parameter-sized) ------------------
    eye_d = jnp.eye(D, dtype=f32)
    a_mat = (eye_d[:, :, None] * wf[None, :, :]).reshape(D, D * K)   # (D, D*K)
    c_vec = bf.reshape(1, D * K)                                     # (1, D*K)
    wper_mat = jnp.kron(eye_d, wpf[1:, :])                           # (D*K, D*P)
    wlin_mat = jnp.kron(jnp.diag(w0f), wpf[0:1, :])                  # (D, D*P)
    bias_vec = (b0f[:, None] * wpf[0][None, :] + bpf[None, :]).reshape(1, D * P)

    # --- batch tiling (multiple of 8 sublanes, pad B if needed) --------------
    tb = min(batch_tile, B)
    tb = max(8, (tb // 8) * 8)
    b_pad = pl.cdiv(B, tb) * tb
    x_in = x if b_pad == B else jnp.pad(x, ((0, b_pad - B), (0, 0)))

    out_flat = pl.pallas_call(
        temporal_embedding_kernel,
        out_shape=jax.ShapeDtypeStruct((b_pad, D * P), x.dtype),
        grid=(b_pad // tb,),
        in_specs=[
            pl.BlockSpec((tb, D), lambda i: (i, 0)),          # x (streamed)
            pl.BlockSpec((D, D * K), lambda i: (0, 0)),       # A        (resident)
            pl.BlockSpec((1, D * K), lambda i: (0, 0)),       # c        (resident)
            pl.BlockSpec((D * K, D * P), lambda i: (0, 0)),   # W_per    (resident)
            pl.BlockSpec((D, D * P), lambda i: (0, 0)),       # W_lin    (resident)
            pl.BlockSpec((1, D * P), lambda i: (0, 0)),       # bias     (resident)
        ],
        out_specs=pl.BlockSpec((tb, D * P), lambda i: (i, 0)),
        compiler_params=pltpu.CompilerParams(
            dimension_semantics=("parallel",)),
    )(x_in, a_mat, c_vec, wper_mat, wlin_mat, bias_vec)

    return out_flat[:B].reshape(B, D, P)


def temporal_embedding_reference(x, w0, b0, w, b, w_proj, b_proj):
    """Pure-JAX reference mirroring the PyTorch forward."""
    v = w0 * x + b0                                                   # (B, D)
    periodic = jnp.sin(w[None, :, :] * x[..., None] + b[None, :, :])  # (B, D, E-1)
    te = jnp.concatenate([v[..., None], periodic], axis=-1)           # (B, D, E)
    return te @ w_proj + b_proj                                       # (B, D, P)


if __name__ == "__main__":
    B, input_dim, embed_dim, proj_dim = 8, 4, 32, 32

    key = jax.random.PRNGKey(0)
    kx, k0, k1, k2, k3, k4, k5 = jax.random.split(key, 7)

    x = jax.random.normal(kx, (B, input_dim), dtype=jnp.float32)
    w0 = jax.random.normal(k0, (input_dim,), dtype=jnp.float32)
    b0 = jax.random.normal(k1, (input_dim,), dtype=jnp.float32)
    w = jax.random.normal(k2, (input_dim, embed_dim - 1), dtype=jnp.float32)
    b = jax.random.normal(k3, (input_dim, embed_dim - 1), dtype=jnp.float32)
    # nn.Linear(embed_dim, proj_dim): stored here already transposed as (E, P).
    bound = 1.0 / (embed_dim ** 0.5)
    w_proj = jax.random.uniform(k4, (embed_dim, proj_dim), dtype=jnp.float32,
                                minval=-bound, maxval=bound)
    b_proj = jax.random.uniform(k5, (proj_dim,), dtype=jnp.float32,
                                minval=-bound, maxval=bound)

    out = temporal_embedding(x, w0, b0, w, b, w_proj, b_proj)
    out = jax.block_until_ready(out)

    ref = temporal_embedding_reference(x, w0, b0, w, b, w_proj, b_proj)
    assert out.shape == (B, input_dim, proj_dim)
    assert jnp.allclose(out, ref, atol=1e-4, rtol=1e-4), "mismatch vs reference"

    print("KERNEL_OK")
</pallas_src>

<mosaic_0001>
module attributes {stable_mosaic.version = 11 : i64} {
  func.func @temporal_embedding_kernel(%arg0: i32, %arg1: memref<8x4xf32, #tpu.memory_space<vmem>>, %arg2: memref<4x124xf32, #tpu.memory_space<vmem>>, %arg3: memref<1x124xf32, #tpu.memory_space<vmem>>, %arg4: memref<124x128xf32, #tpu.memory_space<vmem>>, %arg5: memref<4x128xf32, #tpu.memory_space<vmem>>, %arg6: memref<1x128xf32, #tpu.memory_space<vmem>>, %arg7: memref<8x128xf32, #tpu.memory_space<vmem>>) attributes {dimension_semantics = [#tpu.dimension_semantics<parallel>], iteration_bounds = array<i64: 1>, scalar_prefetch = 0 : i64, scratch_operands = 0 : i64, tpu.core_type = #tpu.core_type<tc>, window_params = [{transform_indices = @transform_0, window_bounds = array<i64: 8, 4>}, {pipeline_mode = #tpu.pipeline_mode<synchronous>, transform_indices = @transform_1, window_bounds = array<i64: 4, 124>}, {pipeline_mode = #tpu.pipeline_mode<synchronous>, transform_indices = @transform_2, window_bounds = array<i64: 1, 124>}, {pipeline_mode = #tpu.pipeline_mode<synchronous>, transform_indices = @transform_3, window_bounds = array<i64: 124, 128>}, {pipeline_mode = #tpu.pipeline_mode<synchronous>, transform_indices = @transform_4, window_bounds = array<i64: 4, 128>}, {pipeline_mode = #tpu.pipeline_mode<synchronous>, transform_indices = @transform_5, window_bounds = array<i64: 1, 128>}, {transform_indices = @transform_6, window_bounds = array<i64: 8, 128>}]} {
    %c0 = arith.constant 0 : index
    %c0_0 = arith.constant 0 : index
    %0 = vector.load %arg1[%c0, %c0_0] : memref<8x4xf32, #tpu.memory_space<vmem>>, vector<8x4xf32>
    %c0_1 = arith.constant 0 : index
    %c0_2 = arith.constant 0 : index
    %1 = vector.load %arg2[%c0_1, %c0_2] : memref<4x124xf32, #tpu.memory_space<vmem>>, vector<4x124xf32>
    %cst = arith.constant dense<0.000000e+00> : vector<8x124xf32>
    %2 = tpu.matmul %0, %1, %cst {dimension_numbers = #tpu.dot_dimension_numbers<[1], [0], [0], [1], [0, 0, 1, 1], [], []>} : vector<8x4xf32>, vector<4x124xf32>, vector<8x124xf32> -> vector<8x124xf32>
    %c0_3 = arith.constant 0 : index
    %c0_4 = arith.constant 0 : index
    %3 = vector.load %arg3[%c0_3, %c0_4] : memref<1x124xf32, #tpu.memory_space<vmem>>, vector<1x124xf32>
    %4 = vector.broadcast %3 : vector<1x124xf32> to vector<8x124xf32>
    %5 = arith.addf %2, %4 : vector<8x124xf32>
    %6 = math.sin %5 : vector<8x124xf32>
    %c0_5 = arith.constant 0 : index
    %c0_6 = arith.constant 0 : index
    %7 = vector.load %arg4[%c0_5, %c0_6] : memref<124x128xf32, #tpu.memory_space<vmem>>, vector<124x128xf32>
    %cst_7 = arith.constant dense<0.000000e+00> : vector<8x128xf32>
    %8 = tpu.matmul %6, %7, %cst_7 {dimension_numbers = #tpu.dot_dimension_numbers<[1], [0], [0], [1], [0, 0, 1, 1], [], []>} : vector<8x124xf32>, vector<124x128xf32>, vector<8x128xf32> -> vector<8x128xf32>
    %c0_8 = arith.constant 0 : index
    %c0_9 = arith.constant 0 : index
    %9 = vector.load %arg5[%c0_8, %c0_9] : memref<4x128xf32, #tpu.memory_space<vmem>>, vector<4x128xf32>
    %cst_10 = arith.constant dense<0.000000e+00> : vector<8x128xf32>
    %10 = tpu.matmul %0, %9, %cst_10 {dimension_numbers = #tpu.dot_dimension_numbers<[1], [0], [0], [1], [0, 0, 1, 1], [], []>} : vector<8x4xf32>, vector<4x128xf32>, vector<8x128xf32> -> vector<8x128xf32>
    %11 = arith.addf %8, %10 : vector<8x128xf32>
    %c0_11 = arith.constant 0 : index
    %c0_12 = arith.constant 0 : index
    %12 = vector.load %arg6[%c0_11, %c0_12] : memref<1x128xf32, #tpu.memory_space<vmem>>, vector<1x128xf32>
    %13 = vector.broadcast %12 : vector<1x128xf32> to vector<8x128xf32>
    %14 = arith.addf %11, %13 : vector<8x128xf32>
    %c0_13 = arith.constant 0 : index
    %c0_14 = arith.constant 0 : index
    %15 = vector.load %arg7[%c0_13, %c0_14] : memref<8x128xf32, #tpu.memory_space<vmem>>, vector<8x128xf32>
    tpu.vector_store %arg7[%c0_13, %c0_14], %14 {strides = array<i32>} : memref<8x128xf32, #tpu.memory_space<vmem>>, vector<8x128xf32>,
    return
  }
  func.func @transform_0(%arg0: i32) -> (i32, i32) {
    %c0_i32 = arith.constant 0 : i32
    %c0_i32_0 = arith.constant 0 : i32
    return %arg0, %c0_i32 : i32, i32
  }
  func.func @transform_1(%arg0: i32) -> (i32, i32) {
    %c0_i32 = arith.constant 0 : i32
    %c0_i32_0 = arith.constant 0 : i32
    %c0_i32_1 = arith.constant 0 : i32
    return %c0_i32, %c0_i32_0 : i32, i32
  }
  func.func @transform_2(%arg0: i32) -> (i32, i32) {
    %c0_i32 = arith.constant 0 : i32
    %c0_i32_0 = arith.constant 0 : i32
    %c0_i32_1 = arith.constant 0 : i32
    return %c0_i32, %c0_i32_0 : i32, i32
  }
  func.func @transform_3(%arg0: i32) -> (i32, i32) {
    %c0_i32 = arith.constant 0 : i32
    %c0_i32_0 = arith.constant 0 : i32
    %c0_i32_1 = arith.constant 0 : i32
    return %c0_i32, %c0_i32_0 : i32, i32
  }
  func.func @transform_4(%arg0: i32) -> (i32, i32) {
    %c0_i32 = arith.constant 0 : i32
    %c0_i32_0 = arith.constant 0 : i32
    %c0_i32_1 = arith.constant 0 : i32
    return %c0_i32, %c0_i32_0 : i32, i32
  }
  func.func @transform_5(%arg0: i32) -> (i32, i32) {
    %c0_i32 = arith.constant 0 : i32
    %c0_i32_0 = arith.constant 0 : i32
    %c0_i32_1 = arith.constant 0 : i32
    return %c0_i32, %c0_i32_0 : i32, i32
  }
  func.func @transform_6(%arg0: i32) -> (i32, i32) {
    %c0_i32 = arith.constant 0 : i32
    %c0_i32_0 = arith.constant 0 : i32
    return %arg0, %c0_i32 : i32, i32
  }
}

</mosaic_0001>

<bundles_post_ra>
// kernel: tpu_custom_call.1
= control target key start
LH: loop header
LB: loop body
LE: loop exit
PB: predicated region body
PF: predicated region fallthrough
CT: control target
= control target key end

     0   :  { %11 = vsyncpa [#allocation3], 0  ;;  %s707_s0 = inlined_call_operand.vmem [shape: f32[8,4], index: 0, kind: input, shape index: {}]   ;;  %s708_s1 = inlined_call_operand.vmem [shape: f32[4,124], index: 1, kind: input, shape index: {}]   ;;  %s709_s2 = inlined_call_operand.vmem [shape: f32[1,124], index: 2, kind: input, shape index: {}]   ;;  %s710_s3 = inlined_call_operand.hbm [shape: f32[124,128], index: 3, kind: input, shape index: {}]   ;;  %s711_s4 = inlined_call_operand.vmem [shape: f32[4,128], index: 4, kind: input, shape index: {}]   ;;  %s712_s5 = inlined_call_operand.vmem [shape: f32[1,128], index: 5, kind: input, shape index: {}]   ;;  %s713_s6 = inlined_call_operand.hbm [shape: f32[8,128], index: 6, kind: output, shape index: {}]  }
   0x1   :  { %12 = vsyncpa [#allocation4], 0  ;;  %s593_s21 = smov [#allocation2]   ;;  %s545_s25 = scalar_lea.hbm %s710_s3, 2048 }
   0x2   :  { %s24_s22 = sshll.u32 %s593_s21, 4  ;;  %p546_p0 = scmp.ne.s32.totalorder %s710_s3, %s545_s25  ;;  %s25_s22 = int_to_ptr.vmem [resolvable:$true] %s24_s22 }
   0x3   :  { %p549_p1 = scmp.lt.u32.totalorder %s545_s25, %s710_s3 }
   0x5   :  { %p551_p2 = pnand %p549_p1, %p546_p0 }
   0x7   :  { %554 = shalt.err (!%p551_p2)
}
   0x8   :  { %s555_s30 = scalar_lea.vmem %s25_s22, 2048  ;;  %p560_p4 = scmp.lt.s32.totalorder %s25_s22, %s25_s22 }
   0x9   :  { %p556_p3 = scmp.ne.s32.totalorder %s25_s22, %s555_s30  ;;  %p561_p5 = scmp.lt.s32.totalorder %s555_s30, %s555_s30 }
   0xb   :  { %p562_p6 = por %p561_p5, %p560_p4 }
   0xd   :  { %p563_p7 = pnand %p562_p6, %p556_p3 }
   0xf   :  { %566 = shalt.err (!%p563_p7)
}
  0x10   :  { %s594_s7 = smov 128   ;;  %s595_s8 = smov 8  }
  0x11   :  { %30 = dma.hbm_to_vmem [thread:$0]  %s710_s3, 2048, %s25_s22, [#allocation3], %s594_s7, %s594_s7, %s595_s8  }
  0x12   :  { %589 = dma.done.wait [#allocation3], 2048  }
  0x13   :  { %590 = vsyncadd [#allocation3], 4294965248  ;;  %v596_v0 = vmov 0.0   ;;  %vm597_vm0 = vmmov 0   ;;  %vm51_vm1 = vcmask 1043456   ;;  %vm47_vm2 = vcmask 31744  }
  0x14   :  { %453 = vmatprep.subr.mxu1 %v596_v0  ;;  %455 = vmatprep.mubr.msk.f32.mxu1 %vm597_vm0, %v596_v0  ;;  %v39_v1 = vld [vmem:[%s708_s1] sm:$0xf]  ;;  %v230_v4 = vld [vmem:[#allocation2 + $0x8] sm:$0xff]  ;;  %v598_v6 = vmov 0.0|0.0   ;;  %v231_v7 = vld [vmem:[#allocation2 + $0x10] sm:$0xff]  ;;  %vm599_vm3 = vmmov 1  }
  0x15   :  { %495 = vmatprep.mubr.msk.f32.mxu0 %vm597_vm0, %v596_v0  ;;  %v38_v2 = vld [vmem:[%s707_s0] sm:$0xff]  ;;  %454 = vmatpush3.msk.msra.mxu1 %vm51_vm1, %v39_v1  ;;  %v232_v8 = vld [vmem:[#allocation2 + $0x18] sm:$0xff]  ;;  %v234_v11 = vld [vmem:[#allocation2 + $0x28] sm:$0xff]  ;;  %v600_v43 = vmov 683565275   ;;  %s606_s16 = smov [#allocation5]  }
  0x16   :  { %456 = vmatmul.mubr.msk.f32.vlgmr.msra.gmra.mrb[0].mxu1 %vm47_vm2, %v38_v2  ;;  %458 = vmatprep.subr.mxu1 %v596_v0  ;;  %v229_v3 = vld [vmem:[#allocation2] sm:$0xff]  ;;  %v502_v9 = vpack.c.bf16 %v232_v8, %v231_v7  ;;  %v235_v13 = vld [vmem:[#allocation2 + $0x30] sm:$0xff]  ;;  %v236_v14 = vld [vmem:[#allocation2 + $0x38] sm:$0xff]  ;;  %v601_v45 = vmov 2475754826   ;;  %s411_s17 = sshll.u32 %s606_s16, 4  ;;  %s412_s17 = int_to_ptr.vmem [resolvable:$true] %s411_s17 }
  0x17   :  { %460 = vmatprep.mubr.msk.f32.mxu1 %vm597_vm0, %v596_v0  ;;  %v499_v5 = vpack.c.bf16 %v230_v4, %v229_v3  ;;  %498 = vmatprep.subr.bf16.mxu0 %v598_v6  ;;  %v233_v10 = vld [vmem:[#allocation2 + $0x20] sm:$0xff]  ;;  %v508_v15 = vpack.c.bf16 %v236_v14, %v235_v13  ;;  %v238_v17 = vld [vmem:[#allocation2 + $0x48] sm:$0xff]  ;;  %v239_v19 = vld [vmem:[#allocation2 + $0x50] sm:$0xff]  ;;  %v602_v48 = vmov 2131351028   ;;  %s567_s18 = scalar_lea.vmem %s412_s17, 128  ;;  %p572_p9 = scmp.lt.s32.totalorder %s412_s17, %s412_s17 }
  0x18   :  { %v505_v12 = vpack.c.bf16 %v234_v11, %v233_v10  ;;  %v237_v16 = vld [vmem:[#allocation2 + $0x40] sm:$0xff]  ;;  %v240_v20 = vld [vmem:[#allocation2 + $0x58] sm:$0xff]  ;;  %v242_v24 = vld [vmem:[#allocation2 + $0x68] sm:$0xff]  ;;  %v603_v51 = vmov 2102212464   ;;  %p568_p8 = scmp.ne.s32.totalorder %s412_s17, %s567_s18  ;;  %p573_p10 = scmp.lt.s32.totalorder %s567_s18, %s567_s18 }
  0x19   :  { %500 = vmatpush3.bf16.msra.mxu0 %v499_v5  ;;  %v511_v18 = vpack.c.bf16 %v238_v17, %v237_v16  ;;  %v245_v21 = vld [vmem:[%s711_s4] sm:$0xf]  ;;  %v514_v22 = vpack.c.bf16 %v240_v20, %v239_v19  ;;  %v243_v26 = vld [vmem:[#allocation2 + $0x70] sm:$0xff]  ;;  %v244_v27 = vld [vmem:[#allocation2 + $0x78] sm:$0xf] }
  0x1a   :  { %501 = vmatprep.subr.bf16.mxu0 %v598_v6  ;;  %459 = vmatpush3.msk.msra.mxu1 %vm51_vm1, %v245_v21  ;;  %v241_v23 = vld [vmem:[#allocation2 + $0x60] sm:$0xff]  ;;  %v520_v28 = vpack.c.bf16 %v244_v27, %v243_v26  ;;  %vm521_vm4 = vmpackc.low %vm51_vm1, %vm599_vm3  ;;  %v604_v54 = vmov 920167782   ;;  %v605_v57 = vmov 1326507024   ;;  %vm319_vm1 = vcmask 1014784   ;;  %p574_p11 = por %p573_p10, %p572_p9 }
  0x1b   :  { %461 = vmatmul.mubr.msk.f32.vlgmr.msra.gmra.mrb[2].mxu1 %vm47_vm2, %v38_v2  ;;  %v517_v25 = vpack.c.bf16 %v242_v24, %v241_v23  ;;  %v420_v29 = vld [vmem:[%s709_s2] ss:$0 sm:$0xff] }
  0x1c   :  { %p575_p12 = pnand %p574_p11, %p568_p8 }
  0x1d   :  { %503 = vmatpush3.bf16.msra.mxu0 %v502_v9 }
  0x1e   :  { %504 = vmatprep.subr.bf16.mxu0 %v598_v6 }
  0x21   :  { %506 = vmatpush3.bf16.msra.mxu0 %v505_v12 }
  0x22   :  { %507 = vmatprep.subr.bf16.mxu0 %v598_v6 }
  0x25   :  { %509 = vmatpush3.bf16.msra.mxu0 %v508_v15 }
  0x26   :  { %510 = vmatprep.subr.bf16.mxu0 %v598_v6 }
  0x29   :  { %512 = vmatpush3.bf16.msra.mxu0 %v511_v18 }
  0x2a   :  { %513 = vmatprep.subr.bf16.mxu0 %v598_v6 }
  0x2d   :  { %515 = vmatpush3.bf16.msra.mxu0 %v514_v22 }
  0x2e   :  { %516 = vmatprep.subr.bf16.mxu0 %v598_v6 }
  0x31   :  { %518 = vmatpush3.bf16.msra.mxu0 %v517_v25 }
  0x32   :  { %519 = vmatprep.subr.bf16.mxu0 %v598_v6 }
  0x35   :  { %522 = vmatpush3.bf16.msk.msra.mxu0 %vm521_vm4, %v520_v28 }
  0xe9   :  { %v121_v30 = vpop.f32.mrb[0].mxu1 }
  0xea   :  { %v671_v31 = vadd.f32 %v420_v29, %v121_v30  ;;  %v457_v32 = vpop.f32.mrb[1].mxu1 }
  0xec   :  { %v128_v33 = vand.u32 2139095040, %v671_v31  ;;  %v125_v37 = vand.u32 2147483647, %v671_v31  ;;  %vm127_vm12 = vcmp.lt.s32.totalorder %v671_v31, 0  ;;  %vm217_vm2 = vweird.f32 %v671_v31 }
  0xee   :  { %v129_v34 = vshrl.u32 %v128_v33, 23  ;;  %v132_v40 = vand.u32 8388607, %v125_v37  ;;  %vm126_vm13 = vcmp.le.f32.partialorder %v125_v37, 0.7853982 }
  0xf0   :  { %v423_v35 = vadd.s32 4294967169, %v129_v34  ;;  %v133_v59 = vor.u32 8388608, %v132_v40 }
  0xf2   :  { %v135_v36 = vadd.s32 1, %v423_v35  ;;  %v173_v9 = vshll.u32 %v133_v59, 8 }
  0xf4   :  { %vm136_vm5 = vcmp.gt.s32.totalorder %v135_v36, 0 }
  0xf5   :  { %v137_v38 = vsel %vm136_vm5, %v135_v36, 0 }
  0xf6   :  { %v139_v39 = vand.u32 31, %v137_v38  ;;  %v138_v42 = vshrl.u32 %v137_v38, 5 }
  0xf8   :  { %v140_v41 = vsub.s32 32, %v139_v39  ;;  %v142_v44 = vshll.u32 %v600_v43, %v139_v39  ;;  %v145_v46 = vshll.u32 %v601_v45, %v139_v39  ;;  %v148_v50 = vshll.u32 %v602_v48, %v139_v39 }
  0xf9   :  { %v151_v53 = vshll.u32 %v603_v51, %v139_v39  ;;  %v154_v56 = vshll.u32 %v604_v54, %v139_v39  ;;  %vm157_vm6 = vcmp.lt.s32.totalorder %v138_v42, 1  ;;  %vm160_vm7 = vcmp.lt.s32.totalorder %v138_v42, 4 }
  0xfa   :  { %v143_v47 = vshrl.u32 %v601_v45, %v140_v41  ;;  %v146_v49 = vshrl.u32 %v602_v48, %v140_v41  ;;  %v149_v52 = vshrl.u32 %v603_v51, %v140_v41  ;;  %v152_v55 = vshrl.u32 %v604_v54, %v140_v41 }
  0xfb   :  { %v155_v58 = vshrl.u32 %v605_v57, %v140_v41  ;;  %v141_v4 = vshrl.u32 %v600_v43, %v140_v41  ;;  %vm159_vm8 = vcmp.lt.s32.totalorder %v138_v42, 3  ;;  %vm158_vm9 = vcmp.lt.s32.totalorder %v138_v42, 2 }
  0xfc   :  { %v144_v60 = vor.u32 %v143_v47, %v142_v44  ;;  %v147_v61 = vor.u32 %v146_v49, %v145_v46  ;;  %v150_v62 = vor.u32 %v149_v52, %v148_v50  ;;  %v153_v63 = vor.u32 %v152_v55, %v151_v53 }
  0xfd   :  { %v156_v0 = vor.u32 %v155_v58, %v154_v56 }
  0xfe   :  { %v162_v1 = vsel %vm160_vm7, %v150_v62, 2102212464  ;;  %v165_v2 = vsel %vm157_vm6, %v144_v60, %v147_v61  ;;  %v169_v3 = vsel %vm157_vm6, %v147_v61, %v150_v62  ;;  %v166_v5 = vsel %vm160_vm7, %v153_v63, 920167782 }
  0xff   :  { %v170_v6 = vsel %vm160_vm7, %v156_v0, 1326507024  ;;  %v167_v7 = vsel %vm159_vm8, %v150_v62, %v166_v5  ;;  %v161_v10 = vsel %vm157_vm6, %v141_v4, %v144_v60  ;;  %v163_v11 = vsel %vm159_vm8, %v147_v61, %v162_v1  ;;  %v315_v61 = vpop.f32.mrb[2].mxu1  ;;  %v431_v0 = vld [vmem:[%s712_s5] ss:$0 sm:$0xff] }
 0x100   :  { %v171_v8 = vsel %vm159_vm8, %v153_v63, %v170_v6  ;;  %v168_v12 = vsel %vm158_vm9, %v165_v2, %v167_v7  ;;  %v164_v18 = vsel %vm158_vm9, %v161_v10, %v163_v11  ;;  %v462_v62 = vpop.f32.mrb[3].mxu1 }
 0x101   :  { %v172_v13 = vsel %vm158_vm9, %v169_v3, %v171_v8  ;;  %v680_v16 = vmul.u32.u64.low %v173_v9, %v168_v12  ;;  %v681_v17 = vmul.u32.u64.high %v173_v9, %v168_v12, %v680_v16  ;;  %v180_v20 = vmul.u32 %v173_v9, %v164_v18 }
 0x102   :  { %v677_v14 = vmul.u32.u64.low %v173_v9, %v172_v13  ;;  %v678_v15 = vmul.u32.u64.high %v173_v9, %v172_v13, %v677_v14 }
 0x103   :  { %v183_v19 = vadd.s32 1, %v681_v17 }
 0x104   :  { %vm182_vm10 = vc.u32 %v678_v15, %v680_v16  ;;  %v181_v33 = vadd.s32 %v680_v16, %v678_v15 }
 0x105   :  { %v184_v21 = vsel %vm182_vm10, %v183_v19, %v681_v17 }
 0x106   :  { %v185_v22 = vadd.s32 %v184_v21, %v180_v20 }
 0x108   :  { %v186_v23 = vadd.s32 536870912, %v185_v22 }
 0x10a   :  { %v187_v24 = vshrl.u32 %v186_v23, 30 }
 0x10c   :  { %v188_v25 = vshll.u32 %v187_v24, 30  ;;  %v211_v46 = vsub.s32 4, %v187_v24 }
 0x10e   :  { %v189_v26 = vsub.s32 %v185_v22, %v188_v25  ;;  %v212_v49 = vsel %vm127_vm12, %v211_v46, %v187_v24 }
 0x10f   :  { %v214_v51 = vsel %vm126_vm13, 0, %v212_v49 }
 0x110   :  { %v191_v27 = vsub.s32 0, %v189_v26  ;;  %v218_v52 = vadd.s32 3, %v214_v51 }
 0x112   :  { %v424_v28 = vmin.u32 %v191_v27, %v189_v26  ;;  %v219_v53 = vand.u32 3, %v218_v52 }
 0x114   :  { %v193_v29 = vclz %v424_v28  ;;  %vm224_vm14 = vcmp.eq.s32.totalorder %v219_v53, 2  ;;  %vm221_vm15 = vcmp.eq.s32.totalorder %v219_v53, 0  ;;  %vm220_vm0 = vcmp.lt.s32.totalorder %v219_v53, 2 }
 0x116   :  { %v425_v30 = vadd.s32 4294967294, %v193_v29 }
 0x118   :  { %vm426_vm11 = vcmp.lt.s32.totalorder %v425_v30, 0 }
 0x119   :  { %v196_v32 = vsel %vm426_vm11, 0, %v425_v30 }
 0x11a   :  { %v197_v34 = vsub.s32 32, %v196_v32  ;;  %v201_v35 = vsub.s32 4294967266, %v196_v32  ;;  %v198_v36 = vshll.u32 %v189_v26, %v196_v32 }
 0x11c   :  { %v199_v38 = vshrl.u32 %v181_v33, %v197_v34  ;;  %v202_v39 = vadd.s32 127, %v201_v35 }
 0x11e   :  { %v200_v40 = vor.u32 %v199_v38, %v198_v36  ;;  %v203_v41 = vshll.u32 %v202_v39, 23 }
 0x120   :  { %v204_v42 = vor.u32 4788187, %v203_v41  ;;  %v207_v44 = vcvt.s32.f32 %v200_v40 }
 0x122   :  { %v205_v43 = vand.u32 2147483647, %v204_v42 }
 0x124   :  { %v208_v45 = vmul.f32 %v207_v44, %v205_v43 }
 0x126   :  { %v209_v47 = vxor.u32 2147483648, %v208_v45 }
 0x128   :  { %v210_v48 = vsel %vm127_vm12, %v209_v47, %v208_v45 }
 0x129   :  { %v213_v50 = vsel %vm126_vm13, %v671_v31, %v210_v48 }
 0x12a   :  { %541 = vcosq.f32 %v213_v50 }
 0x12b   :  { %543 = vsinq.f32 %v213_v50 }
 0x134   :  { %v542_v54 = vpop.eup %541 }
 0x135   :  { %v544_v55 = vpop.eup %543  ;;  %v225_v56 = vxor.u32 2147483648, %v542_v54 }
 0x136   :  { %v222_v57 = vxor.u32 2147483648, %v544_v55 }
 0x137   :  { %v226_v58 = vsel %vm224_vm14, %v225_v56, %v544_v55 }
 0x138   :  { %v223_v59 = vsel %vm221_vm15, %v542_v54, %v222_v57 }
 0x139   :  { %v227_v37 = vsel %vm220_vm0, %v223_v59, %v226_v58 }
 0x13a   :  { %v228_v60 = vsel %vm217_vm2, nan, %v227_v37 }
 0x13b   :  { %496 = vmatmul.mubr.msk.f32.vlgmr.msra.gmra.mrb[0].mxu0 %vm319_vm1, %v228_v60 }
 0x20e   :  { %v392_v63 = vpop.f32.mrb[0].mxu0 }
 0x20f   :  { %v393_v1 = vadd.f32 %v392_v63, %v315_v61  ;;  %v497_v2 = vpop.f32.mrb[1].mxu0 }
 0x211   :  { %v403_v3 = vadd.f32 %v431_v0, %v393_v1 }
 0x213   :  { %404 = vst [vmem:[#allocation5] sm:$0xff] %v403_v3 }
 0x214   :  { %578 = shalt.err (!%p575_p12)
}
 0x215   :  { %s579_s21 = scalar_lea.hbm %s713_s6, 128 }
 0x216   :  { %p580_p13 = scmp.ne.s32.totalorder %s713_s6, %s579_s21  ;;  %p583_p0 = scmp.lt.u32.totalorder %s579_s21, %s713_s6 }
 0x218   :  { %p585_p1 = pnand %p583_p0, %p580_p13 }
 0x21a   :  { %588 = shalt.err (!%p585_p1)
}
 0x21b   :  { %414 = dma.vmem_to_hbm [thread:$0]  %s412_s17, 128, %s713_s6, [#allocation4]  }
 0x21c   :  { %591 = dma.done.wait [#allocation4], 128  }
 0x21d   :  { %592 = vsyncadd [#allocation4], 4294967168 }
 0x21e   :  { %418 = vsyncpa [#allocation3], 1 }
 0x21f   :  { %419 = vsyncpa [#allocation4], 1 }

</bundles_post_ra>
